<compile_context>
chip_gen: v7x
topology: tpu7x:2x2x1
jax: 0.10.0
libtpu: 0.0.40
codegen_flags: <defaults>
</compile_context>

<pallas_src>
import jax
import jax.numpy as jnp
from jax.experimental import pallas as pl
from jax.experimental.pallas import tpu as pltpu

EPS = 1e-10


def _disc_kernel(x_ref, w1_ref, b1_ref, w2_ref, b2_ref, w3_ref, b3_ref,
                 h_out_ref, y_out_ref):
    # --- fc1 (bf16 MXU inputs, f32 accumulate) + batchnorm (batch stats) + relu ---
    h1 = jnp.dot(x_ref[...], w1_ref[...],
                 preferred_element_type=jnp.float32) + b1_ref[...]
    m1 = jnp.mean(h1, axis=0, keepdims=True)
    v1 = jnp.mean((h1 - m1) * (h1 - m1), axis=0, keepdims=True)   # biased variance
    h1 = jnp.maximum((h1 - m1) * jax.lax.rsqrt(v1 + EPS), 0.0)

    # --- fc2 (bf16 MXU inputs, f32 accumulate) + batchnorm (batch stats) + relu ---
    h2 = jnp.dot(h1.astype(jnp.bfloat16), w2_ref[...],
                 preferred_element_type=jnp.float32) + b2_ref[...]
    m2 = jnp.mean(h2, axis=0, keepdims=True)
    v2 = jnp.mean((h2 - m2) * (h2 - m2), axis=0, keepdims=True)
    h2 = jnp.maximum((h2 - m2) * jax.lax.rsqrt(v2 + EPS), 0.0)
    h_out_ref[...] = h2

    # --- disc head (out_features=1): VPU multiply + lane reduction, not MXU ------
    logits = jnp.sum(h2 * w3_ref[...], axis=-1, keepdims=True) + b3_ref[0]
    y_out_ref[...] = jax.nn.sigmoid(logits)


def prepare_params(w1, b1, w2, b2, w3, b3):
    """One-time conversion of (in, out)-layout f32 params to the kernel layout."""
    return (
        w1.astype(jnp.bfloat16),                        # (D, H) bf16  MXU operand
        jnp.reshape(b1, (1, -1)).astype(jnp.float32),   # (1, H) f32
        w2.astype(jnp.bfloat16),                        # (H, H) bf16  MXU operand
        jnp.reshape(b2, (1, -1)).astype(jnp.float32),   # (1, H) f32
        jnp.reshape(w3, (1, -1)).astype(jnp.float32),   # (1, H) f32   VPU head row
        jnp.reshape(b3, (-1,)).astype(jnp.float32),     # (1,)   f32   SMEM scalar
    )


def discriminator_forward(x, params):
    """x: (B, D) single minibatch, or (NB, B, D) stack of independent minibatches."""
    w1, b1, w2, b2, w3_row, b3 = params
    squeeze = x.ndim == 2
    if squeeze:
        x = x[None]
    NB, B, D = x.shape
    H = w1.shape[1]
    x = x.astype(jnp.bfloat16)  # halve the per-step activation DMA

    def const2(shape):  # VMEM-resident across all grid steps (constant block index)
        return pl.BlockSpec(shape, lambda i: (0, 0))

    h_out, y_out = pl.pallas_call(
        _disc_kernel,
        grid=(NB,),
        in_specs=[
            pl.BlockSpec((None, B, D), lambda i: (i, 0, 0)),    # x: pipelined per step
            const2((D, H)), const2((1, H)),                     # w1, b1 resident
            const2((H, H)), const2((1, H)),                     # w2, b2 resident
            const2((1, H)),                                     # w3 row resident
            pl.BlockSpec(memory_space=pltpu.MemorySpace.SMEM),  # b3 scalar
        ],
        out_specs=[
            pl.BlockSpec((None, B, H), lambda i: (i, 0, 0)),
            pl.BlockSpec((None, B, 1), lambda i: (i, 0, 0)),
        ],
        out_shape=(
            jax.ShapeDtypeStruct((NB, B, H), jnp.float32),
            jax.ShapeDtypeStruct((NB, B, 1), jnp.float32),
        ),
        compiler_params=pltpu.CompilerParams(
            dimension_semantics=("parallel",)),
    )(x, w1, b1, w2, b2, w3_row, b3)

    if squeeze:
        h_out, y_out = h_out[0], y_out[0]
    return h_out, y_out


# ----------------------------- reference / test -----------------------------------

def _init_linear(key, fan_in, fan_out):
    # Deterministic init mimicking nn.Linear's U(-1/sqrt(fan_in), 1/sqrt(fan_in)).
    kw, kb = jax.random.split(key)
    bound = 1.0 / jnp.sqrt(jnp.float32(fan_in))
    w = jax.random.uniform(kw, (fan_in, fan_out), jnp.float32, -bound, bound)
    b = jax.random.uniform(kb, (1, fan_out), jnp.float32, -bound, bound)
    return w, b


def _bn(h):
    m = jnp.mean(h, axis=0, keepdims=True)
    v = jnp.mean((h - m) ** 2, axis=0, keepdims=True)
    return (h - m) / jnp.sqrt(v + EPS)


def _reference_bf16(x, w1, b1, w2, b2, w3, b3):
    # Mirrors the kernel numerics: bf16 matmul inputs, f32 accumulation / post-ops.
    h1 = jnp.dot(x.astype(jnp.bfloat16), w1.astype(jnp.bfloat16),
                 preferred_element_type=jnp.float32) + b1
    h1 = jnp.maximum(_bn(h1), 0.0)
    h2 = jnp.dot(h1.astype(jnp.bfloat16), w2.astype(jnp.bfloat16),
                 preferred_element_type=jnp.float32) + b2
    h2 = jnp.maximum(_bn(h2), 0.0)
    y = jax.nn.sigmoid(h2 @ w3 + b3)
    return h2, y


def _reference_f32(x, w1, b1, w2, b2, w3, b3):
    # Pure-f32 math (the PyTorch module's numerics).
    h1 = jnp.maximum(_bn(x @ w1 + b1), 0.0)
    h2 = jnp.maximum(_bn(h1 @ w2 + b2), 0.0)
    y = jax.nn.sigmoid(h2 @ w3 + b3)
    return h2, y


if __name__ == "__main__":
    # Shapes consistent with the module: input_dim=640 -> hidden=input_dim//5=128.
    B, D = 8, 640
    H = D // 5          # 128
    NB = 4              # independent minibatches fused into one pallas_call

    key = jax.random.PRNGKey(0)
    kx, k1, k2, k3 = jax.random.split(key, 4)

    x = jax.random.normal(kx, (NB, B, D), jnp.float32)
    w1, b1 = _init_linear(k1, D, H)
    w2, b2 = _init_linear(k2, H, H)
    w3, b3 = _init_linear(k3, H, 1)

    params = prepare_params(w1, b1, w2, b2, w3, b3)

    h_out, y_out = discriminator_forward(x, params)
    jax.block_until_ready((h_out, y_out))
    assert h_out.shape == (NB, B, H) and y_out.shape == (NB, B, 1)

    for n in range(NB):
        # Tight check vs a reference with matched bf16-matmul / f32-accumulate numerics.
        h_ref, y_ref = _reference_bf16(x[n], w1, b1, w2, b2, w3, b3)
        assert jnp.allclose(h_out[n], h_ref, atol=2e-3, rtol=2e-3)
        assert jnp.allclose(y_out[n], y_ref, atol=1e-3, rtol=1e-3)
        # Loose statistical check vs pure-f32 (PyTorch) math: bf16 weights introduce
        # ~1e-2-level differences on the normalized activations, as expected.
        h32, y32 = _reference_f32(x[n], w1, b1, w2, b2, w3, b3)
        assert float(jnp.mean(jnp.abs(h_out[n] - h32))) < 3e-2
        assert float(jnp.mean(jnp.abs(y_out[n] - y32))) < 1e-2

    # Single-minibatch (2-D) entry point exercises the NB=1 grid path.
    h_one, y_one = discriminator_forward(x[0], params)
    jax.block_until_ready((h_one, y_one))
    assert jnp.allclose(h_one, h_out[0], atol=1e-6)
    assert jnp.allclose(y_one, y_out[0], atol=1e-6)

    print("KERNEL_OK")
</pallas_src>

<mosaic_0001>
module attributes {stable_mosaic.version = 11 : i64} {
  func.func @_disc_kernel(%arg0: i32, %arg1: memref<1x8x640xbf16, #tpu.memory_space<vmem>>, %arg2: memref<640x128xbf16, #tpu.memory_space<vmem>>, %arg3: memref<1x128xf32, #tpu.memory_space<vmem>>, %arg4: memref<128x128xbf16, #tpu.memory_space<vmem>>, %arg5: memref<1x128xf32, #tpu.memory_space<vmem>>, %arg6: memref<1x128xf32, #tpu.memory_space<vmem>>, %arg7: memref<1xf32, #tpu.memory_space<smem>>, %arg8: memref<1x8x128xf32, #tpu.memory_space<vmem>>, %arg9: memref<1x8x1xf32, #tpu.memory_space<vmem>>) attributes {dimension_semantics = [#tpu.dimension_semantics<parallel>], iteration_bounds = array<i64: 4>, scalar_prefetch = 0 : i64, scratch_operands = 0 : i64, tpu.core_type = #tpu.core_type<tc>, window_params = [{transform_indices = @transform_0, window_bounds = array<i64: 1, 8, 640>}, {pipeline_mode = #tpu.pipeline_mode<synchronous>, transform_indices = @transform_1, window_bounds = array<i64: 640, 128>}, {pipeline_mode = #tpu.pipeline_mode<synchronous>, transform_indices = @transform_2, window_bounds = array<i64: 1, 128>}, {pipeline_mode = #tpu.pipeline_mode<synchronous>, transform_indices = @transform_3, window_bounds = array<i64: 128, 128>}, {pipeline_mode = #tpu.pipeline_mode<synchronous>, transform_indices = @transform_4, window_bounds = array<i64: 1, 128>}, {pipeline_mode = #tpu.pipeline_mode<synchronous>, transform_indices = @transform_5, window_bounds = array<i64: 1, 128>}, {transform_indices = @transform_6, window_bounds = array<i64: 1>}, {transform_indices = @transform_7, window_bounds = array<i64: 1, 8, 128>}, {transform_indices = @transform_8, window_bounds = array<i64: 1, 8, 1>}]} {
    %c0 = arith.constant 0 : index
    %c0_0 = arith.constant 0 : index
    %c0_1 = arith.constant 0 : index
    %0 = vector.load %arg1[%c0, %c0_0, %c0_1] : memref<1x8x640xbf16, #tpu.memory_space<vmem>>, vector<1x8x640xbf16>
    %1 = vector.shape_cast %0 : vector<1x8x640xbf16> to vector<8x640xbf16>
    %c0_2 = arith.constant 0 : index
    %c0_3 = arith.constant 0 : index
    %2 = vector.load %arg2[%c0_2, %c0_3] : memref<640x128xbf16, #tpu.memory_space<vmem>>, vector<640x128xbf16>
    %cst = arith.constant dense<0.000000e+00> : vector<8x128xf32>
    %3 = tpu.matmul %1, %2, %cst {dimension_numbers = #tpu.dot_dimension_numbers<[1], [0], [0], [1], [0, 0, 1, 1], [], []>} : vector<8x640xbf16>, vector<640x128xbf16>, vector<8x128xf32> -> vector<8x128xf32>
    %c0_4 = arith.constant 0 : index
    %c0_5 = arith.constant 0 : index
    %4 = vector.load %arg3[%c0_4, %c0_5] : memref<1x128xf32, #tpu.memory_space<vmem>>, vector<1x128xf32>
    %5 = vector.broadcast %4 : vector<1x128xf32> to vector<8x128xf32>
    %6 = arith.addf %3, %5 : vector<8x128xf32>
    %cst_6 = arith.constant dense<0.000000e+00> : vector<128xf32>
    %7 = vector.multi_reduction <add>, %6, %cst_6 [0] : vector<8x128xf32> to vector<128xf32>
    %8 = vector.shape_cast %7 : vector<128xf32> to vector<1x128xf32>
    %cst_7 = arith.constant 8.000000e+00 : f32
    %9 = vector.broadcast %cst_7 : f32 to vector<1x128xf32>
    %10 = arith.divf %8, %9 : vector<1x128xf32>
    %11 = vector.broadcast %10 : vector<1x128xf32> to vector<8x128xf32>
    %12 = arith.subf %6, %11 : vector<8x128xf32>
    %13 = vector.broadcast %10 : vector<1x128xf32> to vector<8x128xf32>
    %14 = arith.subf %6, %13 : vector<8x128xf32>
    %15 = arith.mulf %12, %14 : vector<8x128xf32>
    %cst_8 = arith.constant dense<0.000000e+00> : vector<128xf32>
    %16 = vector.multi_reduction <add>, %15, %cst_8 [0] : vector<8x128xf32> to vector<128xf32>
    %17 = vector.shape_cast %16 : vector<128xf32> to vector<1x128xf32>
    %cst_9 = arith.constant 8.000000e+00 : f32
    %18 = vector.broadcast %cst_9 : f32 to vector<1x128xf32>
    %19 = arith.divf %17, %18 : vector<1x128xf32>
    %20 = vector.broadcast %10 : vector<1x128xf32> to vector<8x128xf32>
    %21 = arith.subf %6, %20 : vector<8x128xf32>
    %cst_10 = arith.constant 1.000000e-10 : f32
    %22 = vector.broadcast %cst_10 : f32 to vector<1x128xf32>
    %23 = arith.addf %19, %22 : vector<1x128xf32>
    %24 = math.rsqrt %23 : vector<1x128xf32>
    %25 = vector.broadcast %24 : vector<1x128xf32> to vector<8x128xf32>
    %26 = arith.mulf %21, %25 : vector<8x128xf32>
    %cst_11 = arith.constant 0.000000e+00 : f32
    %27 = vector.broadcast %cst_11 : f32 to vector<8x128xf32>
    %28 = arith.maximumf %26, %27 : vector<8x128xf32>
    %29 = arith.truncf %28 : vector<8x128xf32> to vector<8x128xbf16>
    %c0_12 = arith.constant 0 : index
    %c0_13 = arith.constant 0 : index
    %30 = vector.load %arg4[%c0_12, %c0_13] : memref<128x128xbf16, #tpu.memory_space<vmem>>, vector<128x128xbf16>
    %cst_14 = arith.constant dense<0.000000e+00> : vector<8x128xf32>
    %31 = tpu.matmul %29, %30, %cst_14 {dimension_numbers = #tpu.dot_dimension_numbers<[1], [0], [0], [1], [0, 0, 1, 1], [], []>} : vector<8x128xbf16>, vector<128x128xbf16>, vector<8x128xf32> -> vector<8x128xf32>
    %c0_15 = arith.constant 0 : index
    %c0_16 = arith.constant 0 : index
    %32 = vector.load %arg5[%c0_15, %c0_16] : memref<1x128xf32, #tpu.memory_space<vmem>>, vector<1x128xf32>
    %33 = vector.broadcast %32 : vector<1x128xf32> to vector<8x128xf32>
    %34 = arith.addf %31, %33 : vector<8x128xf32>
    %cst_17 = arith.constant dense<0.000000e+00> : vector<128xf32>
    %35 = vector.multi_reduction <add>, %34, %cst_17 [0] : vector<8x128xf32> to vector<128xf32>
    %36 = vector.shape_cast %35 : vector<128xf32> to vector<1x128xf32>
    %cst_18 = arith.constant 8.000000e+00 : f32
    %37 = vector.broadcast %cst_18 : f32 to vector<1x128xf32>
    %38 = arith.divf %36, %37 : vector<1x128xf32>
    %39 = vector.broadcast %38 : vector<1x128xf32> to vector<8x128xf32>
    %40 = arith.subf %34, %39 : vector<8x128xf32>
    %41 = vector.broadcast %38 : vector<1x128xf32> to vector<8x128xf32>
    %42 = arith.subf %34, %41 : vector<8x128xf32>
    %43 = arith.mulf %40, %42 : vector<8x128xf32>
    %cst_19 = arith.constant dense<0.000000e+00> : vector<128xf32>
    %44 = vector.multi_reduction <add>, %43, %cst_19 [0] : vector<8x128xf32> to vector<128xf32>
    %45 = vector.shape_cast %44 : vector<128xf32> to vector<1x128xf32>
    %cst_20 = arith.constant 8.000000e+00 : f32
    %46 = vector.broadcast %cst_20 : f32 to vector<1x128xf32>
    %47 = arith.divf %45, %46 : vector<1x128xf32>
    %48 = vector.broadcast %38 : vector<1x128xf32> to vector<8x128xf32>
    %49 = arith.subf %34, %48 : vector<8x128xf32>
    %cst_21 = arith.constant 1.000000e-10 : f32
    %50 = vector.broadcast %cst_21 : f32 to vector<1x128xf32>
    %51 = arith.addf %47, %50 : vector<1x128xf32>
    %52 = math.rsqrt %51 : vector<1x128xf32>
    %53 = vector.broadcast %52 : vector<1x128xf32> to vector<8x128xf32>
    %54 = arith.mulf %49, %53 : vector<8x128xf32>
    %cst_22 = arith.constant 0.000000e+00 : f32
    %55 = vector.broadcast %cst_22 : f32 to vector<8x128xf32>
    %56 = arith.maximumf %54, %55 : vector<8x128xf32>
    %c0_23 = arith.constant 0 : index
    %c0_24 = arith.constant 0 : index
    %c0_25 = arith.constant 0 : index
    %57 = vector.load %arg8[%c0_23, %c0_24, %c0_25] : memref<1x8x128xf32, #tpu.memory_space<vmem>>, vector<1x8x128xf32>
    %58 = vector.shape_cast %57 : vector<1x8x128xf32> to vector<8x128xf32>
    %59 = vector.shape_cast %56 : vector<8x128xf32> to vector<1x8x128xf32>
    tpu.vector_store %arg8[%c0_23, %c0_24, %c0_25], %59 {strides = array<i32>} : memref<1x8x128xf32, #tpu.memory_space<vmem>>, vector<1x8x128xf32>,
    %c0_26 = arith.constant 0 : index
    %c0_27 = arith.constant 0 : index
    %60 = vector.load %arg6[%c0_26, %c0_27] : memref<1x128xf32, #tpu.memory_space<vmem>>, vector<1x128xf32>
    %61 = vector.broadcast %60 : vector<1x128xf32> to vector<8x128xf32>
    %62 = arith.mulf %56, %61 : vector<8x128xf32>
    %cst_28 = arith.constant dense<0.000000e+00> : vector<8xf32>
    %63 = vector.multi_reduction <add>, %62, %cst_28 [1] : vector<8x128xf32> to vector<8xf32>
    %64 = vector.shape_cast %63 : vector<8xf32> to vector<8x1xf32>
    %c0_29 = arith.constant 0 : index
    %65 = memref.load %arg7[%c0_29] : memref<1xf32, #tpu.memory_space<smem>>
    %66 = vector.broadcast %65 : f32 to vector<8x1xf32>
    %67 = arith.addf %64, %66 : vector<8x1xf32>
    %68 = arith.negf %67 : vector<8x1xf32>
    %69 = math.exp %68 : vector<8x1xf32>
    %cst_30 = arith.constant 1.000000e+00 : f32
    %70 = vector.broadcast %cst_30 : f32 to vector<8x1xf32>
    %71 = arith.addf %70, %69 : vector<8x1xf32>
    %72 = arith.divf %70, %71 : vector<8x1xf32>
    %c0_31 = arith.constant 0 : index
    %c0_32 = arith.constant 0 : index
    %c0_33 = arith.constant 0 : index
    %73 = vector.load %arg9[%c0_31, %c0_32, %c0_33] : memref<1x8x1xf32, #tpu.memory_space<vmem>>, vector<1x8x1xf32>
    %74 = vector.shape_cast %73 : vector<1x8x1xf32> to vector<8x1xf32>
    %75 = vector.shape_cast %72 : vector<8x1xf32> to vector<1x8x1xf32>
    tpu.vector_store %arg9[%c0_31, %c0_32, %c0_33], %75 {strides = array<i32>} : memref<1x8x1xf32, #tpu.memory_space<vmem>>, vector<1x8x1xf32>,
    return
  }
  func.func @transform_0(%arg0: i32) -> (i32, i32, i32) {
    %c0_i32 = arith.constant 0 : i32
    %c0_i32_0 = arith.constant 0 : i32
    %c0_i32_1 = arith.constant 0 : i32
    return %arg0, %c0_i32, %c0_i32_0 : i32, i32, i32
  }
  func.func @transform_1(%arg0: i32) -> (i32, i32) {
    %c0_i32 = arith.constant 0 : i32
    %c0_i32_0 = arith.constant 0 : i32
    %c0_i32_1 = arith.constant 0 : i32
    return %c0_i32, %c0_i32_0 : i32, i32
  }
  func.func @transform_2(%arg0: i32) -> (i32, i32) {
    %c0_i32 = arith.constant 0 : i32
    %c0_i32_0 = arith.constant 0 : i32
    %c0_i32_1 = arith.constant 0 : i32
    return %c0_i32, %c0_i32_0 : i32, i32
  }
  func.func @transform_3(%arg0: i32) -> (i32, i32) {
    %c0_i32 = arith.constant 0 : i32
    %c0_i32_0 = arith.constant 0 : i32
    %c0_i32_1 = arith.constant 0 : i32
    return %c0_i32, %c0_i32_0 : i32, i32
  }
  func.func @transform_4(%arg0: i32) -> (i32, i32) {
    %c0_i32 = arith.constant 0 : i32
    %c0_i32_0 = arith.constant 0 : i32
    %c0_i32_1 = arith.constant 0 : i32
    return %c0_i32, %c0_i32_0 : i32, i32
  }
  func.func @transform_5(%arg0: i32) -> (i32, i32) {
    %c0_i32 = arith.constant 0 : i32
    %c0_i32_0 = arith.constant 0 : i32
    %c0_i32_1 = arith.constant 0 : i32
    return %c0_i32, %c0_i32_0 : i32, i32
  }
  func.func @transform_6(%arg0: i32) -> i32 {
    %c0_i32 = arith.constant 0 : i32
    %c0_i32_0 = arith.constant 0 : i32
    return %c0_i32 : i32
  }
  func.func @transform_7(%arg0: i32) -> (i32, i32, i32) {
    %c0_i32 = arith.constant 0 : i32
    %c0_i32_0 = arith.constant 0 : i32
    %c0_i32_1 = arith.constant 0 : i32
    return %arg0, %c0_i32, %c0_i32_0 : i32, i32, i32
  }
  func.func @transform_8(%arg0: i32) -> (i32, i32, i32) {
    %c0_i32 = arith.constant 0 : i32
    %c0_i32_0 = arith.constant 0 : i32
    %c0_i32_1 = arith.constant 0 : i32
    return %arg0, %c0_i32, %c0_i32_0 : i32, i32, i32
  }
}

</mosaic_0001>

<bundles_post_ra>
// kernel: tpu_custom_call.1
= control target key start
LH: loop header
LB: loop body
LE: loop exit
PB: predicated region body
PF: predicated region fallthrough
CT: control target
= control target key end

     0   :  { %s1898_s0 = inlined_call_operand.hbm [shape: bf16[4,8,640], index: 0, kind: input, shape index: {}]   ;;  %s1899_s1 = inlined_call_operand.hbm [shape: bf16[640,128], index: 1, kind: input, shape index: {}]   ;;  %s1900_s2 = inlined_call_operand.vmem [shape: f32[1,128], index: 2, kind: input, shape index: {}]   ;;  %s1901_s3 = inlined_call_operand.hbm [shape: bf16[128,128], index: 3, kind: input, shape index: {}]   ;;  %s1902_s4 = inlined_call_operand.vmem [shape: f32[1,128], index: 4, kind: input, shape index: {}]   ;;  %s1903_s5 = inlined_call_operand.vmem [shape: f32[1,128], index: 5, kind: input, shape index: {}]   ;;  %s1904_s6 = inlined_call_operand.<no memory space> [shape: f32[1], index: 6, kind: input, shape index: {}]   ;;  %s1905_s7 = inlined_call_operand.hbm [shape: f32[4,8,128], index: 7, kind: output, shape index: {0}]   ;;  %s1906_s8 = inlined_call_operand.vmem [shape: f32[4,8,1], index: 8, kind: output, shape index: {1}]  }
   0x1   :  { %1910 = sst [smem:[#allocation13_spill]] %s1899_s1 }
   0x2   :  { %14 = sst [smem:[#allocation2]] %s1904_s6 }
   0x3   :  { %15 = vsyncpa [#allocation4], 0 }
   0x4   :  { %17 = vsyncpa [#allocation4 + $0x1], 0 }
   0x5   :  { %18 = vsyncpa [#allocation7], 0 }
   0x6   :  { %19 = vsyncpa [#allocation5], 0 }
   0x7   :  { %21 = vsyncpa [#allocation5 + $0x1], 0  ;;  %s1664_s29 = smov 0   ;;  %s1666_s30 = smov 0  }
   0x8   :  { %s1668_s9 = smov 0   ;;  %s1670_s10 = smov 0  }
   0x9 LB: > { %s1685_s6 = sadd.s32 4294967295, %s1606_s10   ;;  %s1141_s11 = sadd.s32 4294967294, %s1606_s10   ;;  %s1606_s10 = sphi %s1670_s10, %s1927_s10   ;;  %s1602_s9 = sphi %s1668_s9, %s1926_s9   ;;  %s1598_s30 = sphi %s1666_s30, %s1925_s30   ;;  %s1594_s29 = sphi %s1664_s29, %s1924_s29  }
   0xa   : > { %p47_p0 = scmp.ne.s32.totalorder %s1598_s30, %s1594_s29  ;;  %p1907_p1 = scmp.eq.s32.totalorder %s1685_s6, 0 }
   0xb   : > { %p203_p3 = scmp.eq.s32.totalorder %s1141_s11, 3  ;;  %p1142_p5 = scmp.ge.s32.totalorder %s1606_s10, 1 }
   0xc   : > { %p1694_p4 = por %p1907_p1, %p47_p0  ;;  %p236_p7 = scmp.lt.s32.totalorder %s1606_s10, 5 }
   0xd   : > { %p1699_p6 = por %p203_p3, %p47_p0  ;;  %s1608_s15 = smov [#allocation6]  }
   0xe   : > { %s1911_s12 = scalar_select %p1694_p4, 1, 0 }
   0xf   : > { %s1912_s13 = scalar_select %p1699_p6, 1, 0 }
  0x10   : > { %p1704_p8 = pnand %p1142_p5, %p236_p7  ;;  %s248_s16 = sshll.u32 %s1608_s15, 4  ;;  %s249_s16 = int_to_ptr.vmem [resolvable:$true] %s248_s16 }
  0x11   : > { %s1609_s18 = smov [#allocation8]   ;;  %s1915_s1 = sld [smem:[#allocation13_spill]] }
  0x12   : > { %s1913_s14 = scalar_select %p1704_p8, 1, 0 }
  0x13   : > { %p1330_p9 = pneg %p1704_p8  ;;  %s264_s19 = sshll.u32 %s1609_s18, 4  ;;  %s1716_s19 = int_to_ptr.vmem [resolvable:$true] %s264_s19 }
  0x15   : > { %p1712_p10 = pnand %p1330_p9, %p1907_p1 }
  0x17   : > { %s1450_s22 = scalar_lea.hbm %s1915_s1, 5120  ;;  %p1452_p12 = pneg %p1712_p10 }
  0x18   : > { %p1451_p11 = scmp.ne.s32.totalorder %s1915_s1, %s1450_s22  ;;  %p1457_p3 = scmp.lt.u32.totalorder %s1450_s22, %s1915_s1 }
  0x1a   : > { %p1453_p13 = pnand %p1452_p12, %p1451_p11 }
  0x1c   : > { %p1454_p0 = pneg %p1453_p13 }
  0x1e   : > { %p1459_p5 = pnand %p1457_p3, %p1454_p0 }
  0x20   : > { %1462 = shalt.err (!%p1459_p5)
}
  0x21   : > { %s1463_s27 = scalar_lea.vmem %s249_s16, 5120  ;;  %p1471_p2 = scmp.lt.s32.totalorder %s249_s16, %s249_s16 }
  0x22   : > { %p1464_p7 = scmp.ne.s32.totalorder %s249_s16, %s1463_s27  ;;  %p1472_p6 = scmp.lt.s32.totalorder %s1463_s27, %s1463_s27 }
  0x24   : > { %p1466_p9 = pnand %p1464_p7, %p1452_p12  ;;  %p1473_p4 = por %p1472_p6, %p1471_p2 }
  0x26   : > { %p1467_p1 = pneg %p1466_p9 }
  0x28   : > { %p1474_p8 = pnand %p1473_p4, %p1467_p1 }
  0x2a   : > { %1477 = shalt.err (!%p1474_p8)
}
  0x2b   : > { %s1610_s28 = smov 64   ;;  %s1611_s11 = smov 4  }
  0x2c   : > { %1333 = dma.hbm_to_vmem [thread:$0]  (!%p1712_p10), %s1915_s1, 5120, %s249_s16, [#allocation7], %s1610_s28, %s1610_s28, %s1611_s11  }
  0x2d   : > { %s1478_s22 = scalar_lea.hbm %s1901_s3, 1024 }
  0x2e   : > { %p1479_p11 = scmp.ne.s32.totalorder %s1901_s3, %s1478_s22  ;;  %p1485_p4 = scmp.lt.u32.totalorder %s1478_s22, %s1901_s3 }
  0x30   : > { %p1481_p1 = pnand %p1479_p11, %p1452_p12 }
  0x32   : > { %p1482_p2 = pneg %p1481_p1 }
  0x34   : > { %p1487_p6 = pnand %p1485_p4, %p1482_p2 }
  0x36   : > { %1490 = shalt.err (!%p1487_p6)
}
  0x37   : > { %s1491_s16 = scalar_lea.vmem %s1716_s19, 1024  ;;  %p1499_p3 = scmp.lt.s32.totalorder %s1716_s19, %s1716_s19 }
  0x38   : > { %p1492_p8 = scmp.ne.s32.totalorder %s1716_s19, %s1491_s16  ;;  %p1500_p5 = scmp.lt.s32.totalorder %s1491_s16, %s1491_s16 }
  0x3a   : > { %p1494_p13 = pnand %p1492_p8, %p1452_p12  ;;  %p1501_p7 = por %p1500_p5, %p1499_p3 }
  0x3c   : > { %p1495_p0 = pneg %p1494_p13 }
  0x3e   : > { %p1502_p9 = pnand %p1501_p7, %p1495_p0 }
  0x40   : > { %1505 = shalt.err (!%p1502_p9)
}
  0x41   : > { %1336 = dma.hbm_to_vmem [thread:$0]  (!%p1712_p10), %s1901_s3, 1024, %s1716_s19, [#allocation7], %s1610_s28, %s1610_s28, %s1611_s11  }
  0x42   : > { %s1766_s18 = sadd.s32 1, %s1606_s10   ;;  %s34_s17 = sadd.s32 1, %s1602_s9 }
  0x43   : > { %s31_s20 = ssub.s32 %s1606_s10, %s1766_s18  ;;  %p41_p12 = scmp.ne.s32.totalorder %s1602_s9, %s1598_s30 }
  0x44   : > { %p32_p11 = scmp.eq.s32.totalorder %s31_s20, 0  ;;  %p42_p1 = scmp.eq.s32.totalorder %s1606_s10, 0 }
  0x45   : > { %p1916_p2 = scmp.eq.s32.totalorder %s1685_s6, 3  ;;  %p1347_p6 = scmp.lt.s32.totalorder %s1606_s10, 4 }
  0x46   : > { %s1782_s22 = scalar_select %p32_p11, %s1602_s9, %s34_s17  }
  0x47   : > { %p1776_p4 = por %p1916_p2, %p41_p12  ;;  %p43_p8 = por %p42_p1, %p41_p12 }
  0x48   : > { %s287_s23 = sand.u32 1, %s1602_s9   ;;  %s1316_s19 = smul.u32 320, %s1606_s10 }
  0x49   : > { %s1315_s24 = smul.u32 20, %s287_s23  ;;  %p1786_p10 = pnand %p1347_p6, %p43_p8 }
  0x4a   : > { %s1793_s26 = scalar_lea.hbm %s1898_s0, %s1316_s19  ;;  %s288_s15 = scalar_lea.sflag [#allocation4], %s287_s23 }
  0x4b   : > { %s291_s16 = scalar_lea.vmem [#allocation3], %s1315_s24  ;;  %s1506_s17 = scalar_lea.hbm %s1793_s26, 320 }
  0x4c   : > { %s299_s27 = sshll.u32 %s291_s16, 4  ;;  %p1507_p13 = scmp.ne.s32.totalorder %s1793_s26, %s1506_s17  ;;  %s1795_s27 = int_to_ptr.vmem [resolvable:$true] %s299_s27 }
  0x4d   : > { %p1508_p0 = pneg %p1786_p10  ;;  %s1511_s11 = scalar_lea.hbm %s1898_s0, 1280 }
  0x4e   : > { %p1512_p7 = scmp.lt.u32.totalorder %s1793_s26, %s1898_s0  ;;  %p1513_p9 = scmp.lt.u32.totalorder %s1511_s11, %s1506_s17 }
  0x4f   : > { %p1509_p3 = pnand %p1508_p0, %p1507_p13  ;;  %p1515_p11 = scmp.lt.u32.totalorder %s1506_s17, %s1793_s26 }
  0x50   : > { %p1514_p12 = por %p1513_p9, %p1512_p7 }
  0x51   : > { %p1510_p5 = pneg %p1509_p3 }
  0x52   : > { %p1516_p1 = por %p1515_p11, %p1514_p12 }
  0x54   : > { %p1517_p2 = pnand %p1516_p1, %p1510_p5 }
  0x56   : > { %1520 = shalt.err (!%p1517_p2)
}
  0x57   : > { %s1521_s23 = scalar_lea.vmem %s1795_s27, 320  ;;  %s1612_s24 = smov [#allocation3]  }
  0x58   : > { %p1522_p6 = scmp.ne.s32.totalorder %s1795_s27, %s1521_s23  ;;  %s1526_s16 = sshll.u32 %s1612_s24, 4  ;;  %s1527_s16 = int_to_ptr.vmem [resolvable:$false] %s1526_s16 }
  0x59   : > { %s1528_s1 = scalar_lea.vmem %s1527_s16, 640  ;;  %p1529_p3 = scmp.lt.s32.totalorder %s1795_s27, %s1527_s16 }
  0x5a   : > { %p1524_p8 = pnand %p1522_p6, %p1508_p0  ;;  %p1530_p7 = scmp.lt.s32.totalorder %s1528_s1, %s1521_s23 }
  0x5c   : > { %p1525_p13 = pneg %p1524_p8  ;;  %p1531_p9 = por %p1530_p7, %p1529_p3 }
  0x5e   : > { %p1532_p12 = pnand %p1531_p9, %p1525_p13 }
  0x60   : > { %1535 = shalt.err (!%p1532_p12)
}
  0x61   : > { %1340 = dma.hbm_to_vmem [thread:$0]  (!%p1786_p10), %s1793_s26, 320, %s1795_s27, %s288_s15  }
  0x62   : > { %p1919_p5 = scmp.ne.s32.totalorder %s1913_s14, 0 }
  0x63   : > { %s1825_s17 = sand.u32 (!%p1919_p5), 1, %s1598_s30   ;;  %p1920_p0 = scmp.ne.s32.totalorder (!%p1919_p5), %s1911_s12, 0 }
  0x64   : > { %308 = sbr.rel (%p1919_p5) target bundleno = 877 (0x36d), region = 48  ;;  %s311_s19 = scalar_lea.sflag (!%p1919_p5), [#allocation4], %s1825_s17 }
  0x65   : > { %s1317_s20 = smul.u32 (!%p1919_p5), 20, %s1825_s17 }
  0x67   : > { %s1829_s11 = scalar_lea.vmem (!%p1919_p5), [#allocation3], %s1317_s20 }
  0x6b   : > { %1581 = dma.done.wait (%p1920_p0), %s311_s19, 320  }
  0x6c   : > { %1583 = vsyncadd (%p1920_p0), %s311_s19, 4294966976  ;;  %p1921_p10 = scmp.eq.s32.totalorder %s1685_s6, 0 }
  0x6e   : > { %1585 = dma.done.wait (%p1921_p10), [#allocation7], 6144   ;;  %p1922_p11 = pmov %p1921_p10 }
  0x6f   : > { %v1389_v0 = vld [vmem:[#allocation6 + $0x40] sm:$0xff]   ;;  %v1393_v4 = vld [vmem:[#allocation6 + $0x48] sm:$0xff]   ;;  %v1397_v8 = vld [vmem:[#allocation6 + $0x50] sm:$0xff]   ;;  %v1613_v35 = vmov 0.0   ;;  %vm1614_vm0 = vmmov 0   ;;  %s1150_s27 = sshll.u32 %s1825_s17, 3 }
  0x70   : > { %1587 = vsyncadd (%p1922_p11), [#allocation7], 4294961152  ;;  %v1390_v1 = vld [vmem:[#allocation6] sm:$0xff]   ;;  %1213 = vmatprep.subr.bf16.mxu0 %v1389_v0  ;;  %v1394_v5 = vld [vmem:[#allocation6 + $0x8] sm:$0xff]   ;;  %s352_s23 = scalar_lea.vmem [#allocation9], %s1150_s27  ;;  %s1210_s24 = sshll.u32 %s1685_s6, 7 }
  0x71   : > { %v1391_v2 = vld [vmem:[#allocation6 + $0xc0] sm:$0xff]   ;;  %1214 = vmatpush3.bf16.msra.mxu0 %v1390_v1  ;;  %v1395_v6 = vld [vmem:[#allocation6 + $0xc8] sm:$0xff]   ;;  %v1398_v9 = vld [vmem:[#allocation6 + $0x10] sm:$0xff]   ;;  %s1025_s16 = sshll.u32 %s352_s23, 4  ;;  %s1856_s19 = scalar_lea.hbm %s1905_s7, %s1210_s24  ;;  %s1026_s16 = int_to_ptr.vmem [resolvable:$true] %s1025_s16 }
  0x72   : > { %v1392_v3 = vld [vmem:[#allocation6 + $0x80] sm:$0xff]   ;;  %1235 = vmatprep.subr.bf16.mxu1 %v1391_v2  ;;  %1215 = vmatprep.subr.bf16.mxu0 %v1393_v4  ;;  %v1396_v7 = vld [vmem:[#allocation6 + $0x88] sm:$0xff]   ;;  %v1399_v10 = vld [vmem:[#allocation6 + $0xd0] sm:$0xff]   ;;  %s1536_s12 = scalar_lea.vmem %s1026_s16, 128  ;;  %s1615_s14 = smov [#allocation9]  }
  0x73   : > { %1236 = vmatpush3.bf16.msra.mxu1 %v1392_v3  ;;  %v1400_v11 = vld [vmem:[#allocation6 + $0x90] sm:$0xff]   ;;  %v1401_v12 = vld [vmem:[#allocation6 + $0x58] sm:$0xff]   ;;  %v1405_v16 = vld [vmem:[#allocation6 + $0x60] sm:$0xff]   ;;  %p1537_p1 = scmp.ne.s32.totalorder %s1026_s16, %s1536_s12  ;;  %s1540_s28 = sshll.u32 %s1615_s14, 4  ;;  %s1541_s28 = int_to_ptr.vmem [resolvable:$false] %s1540_s28 }
  0x74   : > { %1237 = vmatprep.subr.bf16.mxu1 %v1395_v6  ;;  %v1402_v13 = vld [vmem:[#allocation6 + $0x18] sm:$0xff]   ;;  %v1406_v17 = vld [vmem:[#allocation6 + $0x20] sm:$0xff]   ;;  %v1409_v20 = vld [vmem:[#allocation6 + $0x68] sm:$0xff]   ;;  %s1542_s26 = scalar_lea.vmem %s1541_s28, 256  ;;  %p1543_p8 = scmp.lt.s32.totalorder %s1026_s16, %s1541_s28 }
  0x75   : > { %1216 = vmatpush3.bf16.msra.mxu0 %v1394_v5  ;;  %v1403_v14 = vld [vmem:[#allocation6 + $0xd8] sm:$0xff]   ;;  %v1407_v18 = vld [vmem:[#allocation6 + $0xe0] sm:$0xff]   ;;  %v1410_v21 = vld [vmem:[#allocation6 + $0x28] sm:$0xff]   ;;  %p1538_p2 = pnand %p1537_p1, %p1776_p4  ;;  %p1544_p13 = scmp.lt.s32.totalorder %s1542_s26, %s1536_s12 }
  0x76   : > { %1217 = vmatprep.subr.bf16.mxu0 %v1397_v8  ;;  %v1404_v15 = vld [vmem:[#allocation6 + $0x98] sm:$0xff]   ;;  %v1408_v19 = vld [vmem:[#allocation6 + $0xa0] sm:$0xff]   ;;  %v1411_v22 = vld [vmem:[#allocation6 + $0xe8] sm:$0xff]  }
  0x77   : > { %1238 = vmatpush3.bf16.msra.mxu1 %v1396_v7  ;;  %v1412_v23 = vld [vmem:[#allocation6 + $0xa8] sm:$0xff]   ;;  %v1413_v24 = vld [vmem:[#allocation6 + $0x70] sm:$0xff]   ;;  %v1417_v28 = vld [vmem:[#allocation6 + $0x78] sm:$0xff]   ;;  %p1539_p6 = pneg %p1538_p2  ;;  %p1545_p3 = por %p1544_p13, %p1543_p8 }
  0x78   : > { %1239 = vmatprep.subr.bf16.mxu1 %v1399_v10  ;;  %v1414_v25 = vld [vmem:[#allocation6 + $0x30] sm:$0xff]   ;;  %v1418_v29 = vld [vmem:[#allocation6 + $0x38] sm:$0xff]   ;;  %v1425_v39 = vld [vmem:[#allocation6 + $0x100] sm:$0xff]  }
  0x79   : > { %1218 = vmatpush3.bf16.msra.mxu0 %v1398_v9  ;;  %v1415_v26 = vld [vmem:[#allocation6 + $0xf0] sm:$0xff]   ;;  %v1419_v30 = vld [vmem:[#allocation6 + $0xf8] sm:$0xff]   ;;  %v1426_v40 = vld [vmem:[#allocation6 + $0x108] sm:$0xff]   ;;  %p1546_p7 = pnand %p1545_p3, %p1539_p6 }
  0x7a   : > { %1219 = vmatprep.subr.bf16.mxu0 %v1401_v12  ;;  %v1416_v27 = vld [vmem:[#allocation6 + $0xb0] sm:$0xff]   ;;  %v1422_v34 = vld [vmem:[#allocation6 + $0xb8] sm:$0xff]   ;;  %v1429_v43 = vld [vmem:[#allocation6 + $0x120] sm:$0xff]  }
  0x7b   : > { %1240 = vmatpush3.bf16.msra.mxu1 %v1400_v11  ;;  %v364_v31 = vld [vmem:[%s1829_s11] sm:$0xff]  ;;  %v365_v36 = vld [vmem:[%s1829_s11 + $0x8] sm:$0xff]  ;;  %v1433_v47 = vld [vmem:[%s1829_s11 + $0x10] ss:$0 sps:$4 sm:$0xff]   ;;  %s1008_s11 = scalar_lea.sflag [#allocation5], %s1825_s17 }
  0x7c   : > { %1241 = vmatprep.subr.bf16.mxu1 %v1403_v14  ;;  %v1153_v32 = vcombine.low %v364_v31, %v364_v31  ;;  %v1154_v33 = vcombine.high %v364_v31, %v364_v31  ;;  %v1155_v37 = vcombine.low %v365_v36, %v365_v36  ;;  %v1156_v38 = vcombine.high %v365_v36, %v365_v36  ;;  %v1427_v41 = vld [vmem:[#allocation6 + $0x110] sm:$0xff]   ;;  %v1428_v42 = vld [vmem:[#allocation6 + $0x118] sm:$0xff]   ;;  %v1430_v44 = vld [vmem:[#allocation6 + $0x128] sm:$0xff]  }
  0x7d   : > { %1220 = vmatpush3.bf16.msra.mxu0 %v1402_v13  ;;  %v1431_v45 = vld [vmem:[#allocation6 + $0x130] sm:$0xff]   ;;  %v1432_v46 = vld [vmem:[#allocation6 + $0x138] sm:$0xff]   ;;  %v1434_v48 = vld [vmem:[#allocation8] sm:$0xff]  }
  0x7e   : > { %1221 = vmatprep.subr.bf16.mxu0 %v1405_v16  ;;  %744 = vmatprep.mubr.bf16.mxu0 %v1154_v33  ;;  %v1435_v49 = vld [vmem:[#allocation8 + $0x8] sm:$0xff]   ;;  %v1436_v50 = vld [vmem:[#allocation8 + $0x10] sm:$0xff]   ;;  %v1437_v51 = vld [vmem:[#allocation8 + $0x18] sm:$0xff]  }
  0x7f   : > { %1242 = vmatpush3.bf16.msra.mxu1 %v1404_v15  ;;  %784 = vmatprep.mubr.bf16.mxu1 %v1156_v38  ;;  %v1438_v52 = vld [vmem:[#allocation8 + $0x20] sm:$0xff]   ;;  %v1439_v53 = vld [vmem:[#allocation8 + $0x28] sm:$0xff]   ;;  %v1440_v54 = vld [vmem:[#allocation8 + $0x30] sm:$0xff]  }
  0x80   : > { %1243 = vmatprep.subr.bf16.mxu1 %v1407_v18  ;;  %v1441_v55 = vld [vmem:[#allocation8 + $0x38] sm:$0xff]  }
  0x81   : > { %1222 = vmatpush3.bf16.msra.mxu0 %v1406_v17  ;;  %v1152_v57 = vld [vmem:[%s1900_s2] ss:$0 sm:$0xff] }
  0x82   : > { %1223 = vmatprep.subr.bf16.mxu0 %v1409_v20  ;;  %v1198_v31 = vld [vmem:[%s1902_s4] ss:$0 sm:$0xff] }
  0x83   : > { %1244 = vmatpush3.bf16.msra.mxu1 %v1408_v19 }
  0x84   : > { %1245 = vmatprep.subr.bf16.mxu1 %v1411_v22 }
  0x85   : > { %1224 = vmatpush3.bf16.msra.mxu0 %v1410_v21 }
  0x86   : > { %1225 = vmatprep.subr.bf16.mxu0 %v1413_v24 }
  0x87   : > { %1246 = vmatpush3.bf16.msra.mxu1 %v1412_v23 }
  0x88   : > { %1247 = vmatprep.subr.bf16.mxu1 %v1415_v26 }
  0x89   : > { %1226 = vmatpush3.bf16.msra.mxu0 %v1414_v25 }
  0x8a   : > { %1227 = vmatprep.subr.bf16.mxu0 %v1417_v28 }
  0x8b   : > { %1248 = vmatpush3.bf16.msra.mxu1 %v1416_v27 }
  0x8c   : > { %1249 = vmatprep.subr.bf16.mxu1 %v1419_v30 }
  0x8d   : > { %1228 = vmatpush3.bf16.msra.mxu0 %v1418_v29 }
  0x8e   : > { %1275 = vmatprep.subr.bf16.mxu0 %v1613_v35 }
  0x8f   : > { %1250 = vmatpush3.bf16.msra.mxu1 %v1422_v34 }
  0x90   : > { %745 = vmatmul.mubr.bf16.vlgmr.msra.gmra.mrb[0].mxu0 %v1153_v32  ;;  %1295 = vmatprep.subr.bf16.mxu1 %v1613_v35 }
  0x91   : > { %1276 = vmatpush3.bf16.msra.mxu0 %v1425_v39  ;;  %1291 = vmatprep.mubr.msk.bf16.mxu0 %vm1614_vm0, %v1613_v35 }
  0x92   : > { %785 = vmatmul.mubr.bf16.vlgmr.msra.gmra.mrb[0].mxu1 %v1155_v37  ;;  %1277 = vmatprep.subr.bf16.mxu0 %v1613_v35 }
  0x93   : > { %1311 = vmatprep.mubr.msk.bf16.mxu1 %vm1614_vm0, %v1613_v35  ;;  %1296 = vmatpush3.bf16.msra.mxu1 %v1434_v48 }
  0x94   : > { %1297 = vmatprep.subr.bf16.mxu1 %v1613_v35 }
  0x95   : > { %1278 = vmatpush3.bf16.msra.mxu0 %v1426_v40 }
  0x96   : > { %1279 = vmatprep.subr.bf16.mxu0 %v1613_v35 }
  0x97   : > { %1298 = vmatpush3.bf16.msra.mxu1 %v1435_v49 }
  0x98   : > { %1299 = vmatprep.subr.bf16.mxu1 %v1613_v35 }
  0x99   : > { %1280 = vmatpush3.bf16.msra.mxu0 %v1427_v41 }
  0x9a   : > { %1281 = vmatprep.subr.bf16.mxu0 %v1613_v35 }
  0x9b   : > { %1300 = vmatpush3.bf16.msra.mxu1 %v1436_v50 }
  0x9c   : > { %1301 = vmatprep.subr.bf16.mxu1 %v1613_v35 }
  0x9d   : > { %1282 = vmatpush3.bf16.msra.mxu0 %v1428_v42 }
  0x9e   : > { %1283 = vmatprep.subr.bf16.mxu0 %v1613_v35 }
  0x9f   : > { %1302 = vmatpush3.bf16.msra.mxu1 %v1437_v51 }
  0xa0   : > { %1303 = vmatprep.subr.bf16.mxu1 %v1613_v35 }
  0xa1   : > { %1284 = vmatpush3.bf16.msra.mxu0 %v1429_v43 }
  0xa2   : > { %1285 = vmatprep.subr.bf16.mxu0 %v1613_v35 }
  0xa3   : > { %1304 = vmatpush3.bf16.msra.mxu1 %v1438_v52 }
  0xa4   : > { %1305 = vmatprep.subr.bf16.mxu1 %v1613_v35 }
  0xa5   : > { %1286 = vmatpush3.bf16.msra.mxu0 %v1430_v44 }
  0xa6   : > { %1287 = vmatprep.subr.bf16.mxu0 %v1613_v35 }
  0xa7   : > { %1306 = vmatpush3.bf16.msra.mxu1 %v1439_v53 }
  0xa8   : > { %1307 = vmatprep.subr.bf16.mxu1 %v1613_v35 }
  0xa9   : > { %1288 = vmatpush3.bf16.msra.mxu0 %v1431_v45 }
  0xaa   : > { %1289 = vmatprep.subr.bf16.mxu0 %v1613_v35 }
  0xab   : > { %1308 = vmatpush3.bf16.msra.mxu1 %v1440_v54 }
  0xac   : > { %1309 = vmatprep.subr.bf16.mxu1 %v1613_v35 }
  0xad   : > { %1290 = vmatpush3.bf16.msra.mxu0 %v1432_v46 }
  0xaf   : > { %1310 = vmatpush3.bf16.msra.mxu1 %v1441_v55 }
  0xb0   : > { %1292 = vmatmul.mubr.bf16.vlgmr.msra.gmra.mrb[4].mxu0 %v1433_v47 }
 0x163   : > { %v1229_v56 = vpop.f32.mrb[0].mxu0 }
 0x164   : > { %v1230_v58 = vpop.f32.mrb[1].mxu0 }
 0x165   : > { %v1231_v59 = vadd.f32 %v1230_v58, %v1229_v56  ;;  %v1232_v60 = vpop.f32.mrb[2].mxu0  ;;  %v1251_v61 = vpop.f32.mrb[0].mxu1  ;;  %v1207_v56 = vld [vmem:[%s1903_s5] ss:$0 sm:$0xff] }
 0x166   : > { %v1233_v62 = vpop.f32.mrb[3].mxu0  ;;  %v1252_v63 = vpop.f32.mrb[1].mxu1 }
 0x167   : > { %v747_v0 = vadd.f32 %v1231_v59, %v1152_v57  ;;  %v1253_v1 = vadd.f32 %v1252_v63, %v1251_v61  ;;  %v1254_v2 = vpop.f32.mrb[2].mxu1 }
 0x168   : > { %v1255_v3 = vpop.f32.mrb[3].mxu1 }
 0x169   : > { %v787_v4 = vadd.f32 %v1253_v1, %v747_v0 }
 0x183   : > { %v826_v5 = vpop.f32.mrb[4].mxu0 }
 0x184   : > { %v827_v6 = vadd.f32 %v826_v5, %v787_v4  ;;  %v1293_v7 = vpop.f32.mrb[5].mxu0 }
 0x185   : > { %v829_v8 = vpop.f32.mrb[6].mxu0 }
 0x186   : > { %v832_v9 = vrot.slane %v827_v6, 4  ;;  %v1294_v10 = vpop.f32.mrb[7].mxu0 }
 0x188   : > { %v833_v11 = vadd.f32 %v832_v9, %v827_v6 }
 0x18a   : > { %v834_v12 = vrot.slane %v833_v11, 2 }
 0x18c   : > { %v835_v13 = vadd.f32 %v834_v12, %v833_v11 }
 0x18e   : > { %v836_v14 = vrot.slane %v835_v13, 1 }
 0x190   : > { %v837_v15 = vadd.f32 %v836_v14, %v835_v13 }
 0x192   : > { %v839_v16 = vmul.f32 0.125, %v837_v15 }
 0x194   : > { %v840_v17 = vsub.f32 %v827_v6, %v839_v16 }
 0x196   : > { %v841_v18 = vmul.f32 %v840_v17, %v840_v17 }
 0x198   : > { %v842_v19 = vrot.slane %v841_v18, 4 }
 0x19a   : > { %v843_v20 = vadd.f32 %v842_v19, %v841_v18 }
 0x19c   : > { %v844_v21 = vrot.slane %v843_v20, 2 }
 0x19e   : > { %v845_v22 = vadd.f32 %v844_v21, %v843_v20 }
 0x1a0   : > { %v846_v23 = vrot.slane %v845_v22, 1 }
 0x1a2   : > { %v847_v24 = vadd.f32 %v846_v23, %v845_v22 }
 0x1a4   : > { %v848_v25 = vmul.f32 0.125, %v847_v24 }
 0x1a6   : > { %v849_v26 = vadd.f32 1e-10, %v848_v25 }
 0x1a8   : > { %1442 = vrsqrt.f32 %v849_v26 }
 0x1b2   : > { %v1443_v27 = vpop.eup %1442 }
 0x1b3   : > { %v851_v28 = vmul.f32 %v1443_v27, %v840_v17 }
 0x1b5   : > { %v852_v29 = vmax.f32 %v851_v28, 0.0 }
 0x1b7   : > { %v853_v30 = vpack.c.bf16 %v852_v29, %v852_v29 }
 0x1b9   : > { %1312 = vmatmul.mubr.bf16.vlgmr.msra.gmra.mrb[4].mxu1 %v853_v30 }
 0x28c   : > { %v959_v32 = vpop.f32.mrb[4].mxu1 }
 0x28d   : > { %v960_v33 = vadd.f32 %v1198_v31, %v959_v32  ;;  %v1313_v34 = vpop.f32.mrb[5].mxu1 }
 0x28e   : > { %v962_v35 = vpop.f32.mrb[6].mxu1 }
 0x28f   : > { %v965_v36 = vrot.slane %v960_v33, 4  ;;  %v1314_v37 = vpop.f32.mrb[7].mxu1 }
 0x291   : > { %v966_v38 = vadd.f32 %v965_v36, %v960_v33 }
 0x293   : > { %v967_v39 = vrot.slane %v966_v38, 2 }
 0x295   : > { %v968_v40 = vadd.f32 %v967_v39, %v966_v38 }
 0x297   : > { %v969_v41 = vrot.slane %v968_v40, 1 }
 0x299   : > { %v970_v42 = vadd.f32 %v969_v41, %v968_v40 }
 0x29b   : > { %v971_v43 = vmul.f32 0.125, %v970_v42 }
 0x29d   : > { %v972_v44 = vsub.f32 %v960_v33, %v971_v43 }
 0x29f   : > { %v973_v45 = vmul.f32 %v972_v44, %v972_v44 }
 0x2a1   : > { %v974_v46 = vrot.slane %v973_v45, 4 }
 0x2a3   : > { %v975_v47 = vadd.f32 %v974_v46, %v973_v45 }
 0x2a5   : > { %v976_v48 = vrot.slane %v975_v47, 2 }
 0x2a7   : > { %v977_v49 = vadd.f32 %v976_v48, %v975_v47 }
 0x2a9   : > { %v978_v50 = vrot.slane %v977_v49, 1 }
 0x2ab   : > { %v979_v51 = vadd.f32 %v978_v50, %v977_v49 }
 0x2ad   : > { %v980_v52 = vmul.f32 0.125, %v979_v51 }
 0x2af   : > { %v981_v53 = vadd.f32 1e-10, %v980_v52 }
 0x2b1   : > { %1444 = vrsqrt.f32 %v981_v53 }
 0x2bb   : > { %v1445_v54 = vpop.eup %1444 }
 0x2bc   : > { %v983_v55 = vmul.f32 %v1445_v54, %v972_v44 }
 0x2be   : > { %v984_v57 = vmax.f32 %v983_v55, 0.0 }
 0x2c0   : > { %v993_v58 = vmul.f32 %v1207_v56, %v984_v57  ;;  %985 = vst [vmem:[%s352_s23] sm:$0xff] %v984_v57 }
 0x2c2   : > { %994 = vadd.xlane.f32.xlu0 %v993_v58 }
 0x2c3   : > { %1549 = shalt.err (!%p1546_p7)
}
 0x2c4   : > { %s1550_s17 = scalar_lea.hbm %s1856_s19, 128  ;;  %s1554_s25 = scalar_lea.hbm %s1905_s7, 512 }
 0x2c5   : > { %p1551_p9 = scmp.ne.s32.totalorder %s1856_s19, %s1550_s17  ;;  %p1555_p0 = scmp.lt.u32.totalorder %s1856_s19, %s1905_s7 }
 0x2c6   : > { %p1556_p10 = scmp.lt.u32.totalorder %s1554_s25, %s1550_s17  ;;  %p1558_p1 = scmp.lt.u32.totalorder %s1550_s17, %s1856_s19 }
 0x2c7   : > { %p1552_p12 = pnand %p1551_p9, %p1776_p4 }
 0x2c8   : > { %p1557_p11 = por %p1556_p10, %p1555_p0 }
 0x2c9   : > { %p1553_p5 = pneg %p1552_p12 }
 0x2ca   : > { %p1559_p2 = por %p1558_p1, %p1557_p11 }
 0x2cc   : > { %p1560_p6 = pnand %p1559_p2, %p1553_p5 }
 0x2ce   : > { %1563 = shalt.err (!%p1560_p6)
}
 0x2cf   : > { %1328 = dma.vmem_to_hbm [thread:$0]  (%p1776_p4), %s1026_s16, 128, %s1856_s19, %s1008_s11   ;;  %vm1005_vm1 = vcmask 7168  }
 0x2d0   : > { %s996_s1 = sld [smem:[#allocation2]]  ;;  %p359_p8 = scmp.lt.s32.totalorder %s1685_s6, 3 }
 0x2d2   : > { %s1929_s6 = smov (!%p359_p8, %s1685_s6), 3 }
 0x2d3   : > { %s1151_s20 = sshll.u32 %s1929_s6, 3 }
 0x2d4   : > { %s362_s21 = scalar_lea.vmem %s1906_s8, %s1151_s20 }
 0x2d6   : > { %v997_v59 = vstv %s996_s1 }
 0x34f   : > { %v995_v60 = vpop.xlane.xlu0 %994 }
 0x350   : > { %v998_v61 = vadd.f32 %v997_v59, %v995_v60 }
 0x352   : > { %v1208_v62 = vmul.f32 -1.442695, %v998_v61 }
 0x354   : > { %1446 = vpow2.f32 %v1208_v62 }
 0x35e   : > { %v1447_v63 = vpop.eup %1446 }
 0x35f   : > { %v1002_v0 = vadd.f32 1.0, %v1447_v63 }
 0x361   : > { %1448 = vrcp.f32 %v1002_v0 }
 0x36b   : > { %v1449_v1 = vpop.eup %1448 }
 0x36c   : > { %1006 = vst.msk [vmem:[%s362_s21] sm:$0xff] %vm1005_vm1, %v1449_v1 }
 0x36d PF: > { %p1350_p4 = scmp.ge.s32.totalorder %s1606_s10, 2  ;;  %s1040_s16 = sand.u32 1, %s1594_s29  }
 0x36e   : > { %p1923_p13 = scmp.ne.s32.totalorder %s1912_s13, 0  ;;  %s1041_s19 = scalar_lea.sflag [#allocation5], %s1040_s16 }
 0x370   : > { %p1342_p3 = pnand %p1350_p4, %p1923_p13 }
 0x372   : > { %1589 = dma.done.wait (!%p1342_p3), %s1041_s19, 128  }
 0x373   : > { %1591 = vsyncadd (!%p1342_p3), %s1041_s19, 4294967168  ;;  %p24_p7 = scmp.ge.s32.totalorder %s1766_s18, 6   ;;  %s1924_s29 = smov %s1598_s30 }
 0x374   : > { %s1925_s30 = smov %s1602_s9  ;;  %s1926_s9 = smov %s1782_s22 }
 0x375   : > { %s1927_s10 = smov %s1766_s18  ;;  %26 = sbr.rel (!%p24_p7) target bundleno = 9 (0x9), region = 113 }
 0x37c   :  { %1053 = vsyncpa [#allocation4], 1 }
 0x37d   :  { %1055 = vsyncpa [#allocation4 + $0x1], 1 }
 0x37e   :  { %1056 = vsyncpa [#allocation7], 1 }
 0x37f   :  { %1057 = vsyncpa [#allocation5], 1 }
 0x380   :  { %1059 = vsyncpa [#allocation5 + $0x1], 1 }

</bundles_post_ra>
